<compile_context>
chip_gen: v7x
topology: tpu7x:2x2x1
jax: 0.10.0
libtpu: 0.0.40
codegen_flags: <defaults>
</compile_context>

<pallas_src>
import math
import jax
import jax.numpy as jnp
from jax.experimental import pallas as pl
from jax.experimental.pallas import tpu as pltpu


HID = 128   # fc_s / fc_a output width
CAT = 32    # fc_cat output width


# ----------------------------------------------------------------------------
# Kernel: transposed dataflow, batch in the lane dimension.
#   x_ref    : (f_in, tb)   bf16   [state|action]^T tile
#   w_in_ref : (256, f_in)  bf16   blockdiag(Ws, Wa)^T
#   b_in_ref : (256, 1)     f32    [bs|ba]^T
#   wc_ref   : (32, 256)    bf16   Wc^T
#   bc_ref   : (32, 1)      f32
#   wo_ref   : (len_a, 32)  bf16   Wo^T
#   bo_ref   : (len_a, 1)   f32
#   out_ref  : (len_a, tb)  f32    Q^T tile
# ----------------------------------------------------------------------------
def qnet_kernel(x_ref, w_in_ref, b_in_ref, wc_ref, bc_ref, wo_ref, bo_ref,
                out_ref):
    # Fused first layer: [relu(Ws^T s^T + bs) ; relu(Wa^T a^T + ba)]  -> (256, tb)
    h = jnp.dot(w_in_ref[...], x_ref[...], preferred_element_type=jnp.float32)
    h = jnp.maximum(h + b_in_ref[...], 0.0)                       # f32 elementwise

    # fc_cat: (32, 256) @ (256, tb) -- N = tb lane-dense
    h3 = jnp.dot(wc_ref[...], h.astype(wc_ref.dtype),
                 preferred_element_type=jnp.float32)
    h3 = jnp.maximum(h3 + bc_ref[...], 0.0)                       # (32, tb) f32

    # fc_out: (len_a, 32) @ (32, tb)
    q = jnp.dot(wo_ref[...], h3.astype(wo_ref.dtype),
                preferred_element_type=jnp.float32)
    out_ref[...] = (q + bo_ref[...]).astype(out_ref.dtype)        # (len_a, tb)


# ----------------------------------------------------------------------------
# One-time parameter preparation (hoisted out of the per-call hot path).
# ----------------------------------------------------------------------------
def prepare_params(params, compute_dtype=jnp.bfloat16):
    """Fuse fc_s/fc_a into a block-diagonal layer, transpose, cast to bf16."""
    ws, bs, wa, ba, wc, bc, wo, bo = params
    len_s = ws.shape[0]
    len_a = wa.shape[0]
    f_in = len_s + len_a

    w_in = jnp.zeros((f_in, 2 * HID), jnp.float32)
    w_in = w_in.at[:len_s, :HID].set(ws)
    w_in = w_in.at[len_s:, HID:].set(wa)
    b_in = jnp.concatenate([bs, ba], axis=1)                 # (1, 256)

    prepared = (
        w_in.T.astype(compute_dtype),     # (256, f_in)
        b_in.T.astype(jnp.float32),       # (256, 1)
        wc.T.astype(compute_dtype),       # (32, 256)
        bc.T.astype(jnp.float32),         # (32, 1)
        wo.T.astype(compute_dtype),       # (len_a, 32)
        bo.T.astype(jnp.float32),         # (len_a, 1)
    )
    return jax.tree_util.tree_map(jax.block_until_ready, prepared)


def _pick_tile(B):
    """Batch tile (lane dim in the transposed layout).

    Any tile < B must be a multiple of 128 (lane rule).  Prefer 256-512 lanes
    per step and >= 2 grid steps so the 'parallel' axis can shard across the
    two TensorCores on v7x; small / non-128-divisible B runs as a single tile
    (block == full array dims, always legal).
    """
    if B <= 128 or B % 128 != 0:
        return B
    for tb in (512, 256, 1024, 128):
        if B % tb == 0 and B // tb >= 2:
            return tb
    return B


# ----------------------------------------------------------------------------
# Per-call wrapper: only x concat + transpose + cast happen here.
# ----------------------------------------------------------------------------
def qnet_forward(state, action, prepared, *, tb=None,
                 compute_dtype=jnp.bfloat16):
    w_in_t, b_in_t, wc_t, bc_t, wo_t, bo_t = prepared
    B, len_s = state.shape
    Ba, len_a = action.shape
    assert B == Ba
    f_in = w_in_t.shape[1]
    hid2 = w_in_t.shape[0]          # 256
    cat = wc_t.shape[0]             # 32
    assert f_in == len_s + len_a

    tb = _pick_tile(B) if tb is None else tb
    assert B % tb == 0
    assert tb == B or tb % 128 == 0, "tiles < B must be lane-aligned (128)"

    # [state|action]^T, bf16 matmul operand (f32 accumulation inside kernel).
    xT = jnp.concatenate([state, action], axis=1).T.astype(compute_dtype)

    full = lambda shape: pl.BlockSpec(shape, lambda i: (0, 0))

    cost = pl.CostEstimate(
        flops=2 * B * (f_in * hid2 + hid2 * cat + cat * len_a),
        transcendentals=0,
        bytes_accessed=(xT.size * 2 + w_in_t.size * 2 + wc_t.size * 2
                        + wo_t.size * 2 + b_in_t.size * 4 + bc_t.size * 4
                        + bo_t.size * 4 + B * len_a * 4),
    )

    qT = pl.pallas_call(
        qnet_kernel,
        out_shape=jax.ShapeDtypeStruct((len_a, B), jnp.float32),
        grid_spec=pl.GridSpec(
            grid=(B // tb,),
            in_specs=[
                pl.BlockSpec((f_in, tb), lambda i: (0, i)),   # x^T tile
                full((hid2, f_in)), full((hid2, 1)),          # fused fc_s/fc_a
                full((cat, hid2)), full((cat, 1)),            # fc_cat
                full((len_a, cat)), full((len_a, 1)),         # fc_out
            ],
            out_specs=pl.BlockSpec((len_a, tb), lambda i: (0, i)),
        ),
        compiler_params=pltpu.CompilerParams(
            dimension_semantics=("parallel",)),
        cost_estimate=cost,
    )(xT, w_in_t, b_in_t, wc_t, bc_t, wo_t, bo_t)

    return qT.T                                              # (B, len_a)


# ----------------------------------------------------------------------------
# Init + references
# ----------------------------------------------------------------------------
def init_linear(key, fan_in, fan_out):
    # Matches torch nn.Linear default init: U(-1/sqrt(fan_in), 1/sqrt(fan_in)).
    kw, kb = jax.random.split(key)
    bound = 1.0 / math.sqrt(fan_in)
    w = jax.random.uniform(kw, (fan_in, fan_out), jnp.float32, -bound, bound)
    b = jax.random.uniform(kb, (1, fan_out), jnp.float32, -bound, bound)
    return w, b


def qnet_reference_f32(state, action, params):
    ws, bs, wa, ba, wc, bc, wo, bo = params
    h1 = jnp.maximum(state @ ws + bs, 0.0)
    h2 = jnp.maximum(action @ wa + ba, 0.0)
    cat = jnp.concatenate([h1, h2], axis=1)
    h3 = jnp.maximum(cat @ wc + bc, 0.0)
    return h3 @ wo + bo


def qnet_reference_bf16(state, action, params, compute_dtype=jnp.bfloat16):
    # Same math as the torch module, bf16 matmul operands / f32 accumulation,
    # matching the kernel's precision for a tight assertion.
    ws, bs, wa, ba, wc, bc, wo, bo = params
    dot = lambda a, b: jnp.dot(a.astype(compute_dtype), b.astype(compute_dtype),
                               preferred_element_type=jnp.float32)
    h1 = jnp.maximum(dot(state, ws) + bs, 0.0)
    h2 = jnp.maximum(dot(action, wa) + ba, 0.0)
    cat = jnp.concatenate([h1, h2], axis=1)
    h3 = jnp.maximum(dot(cat, wc) + bc, 0.0)
    return dot(h3, wo) + bo


if __name__ == "__main__":
    B, len_s, len_a = 8, 16, 8

    key = jax.random.PRNGKey(0)
    k_s, k_a, k1, k2, k3, k4 = jax.random.split(key, 6)

    state = jax.random.normal(k_s, (B, len_s), jnp.float32)
    action = jax.random.normal(k_a, (B, len_a), jnp.float32)

    ws, bs = init_linear(k1, len_s, HID)       # fc_s
    wa, ba = init_linear(k2, len_a, HID)       # fc_a
    wc, bc = init_linear(k3, 2 * HID, CAT)     # fc_cat
    wo, bo = init_linear(k4, CAT, len_a)       # fc_out
    params = (ws, bs, wa, ba, wc, bc, wo, bo)

    # One-time weight fusion/transpose/cast (outside the hot path).
    prepared = prepare_params(params)

    fwd = jax.jit(qnet_forward)
    q_val = fwd(state, action, prepared)
    q_val = jax.block_until_ready(q_val)
    assert q_val.shape == (B, len_a)

    # Tight check against a precision-matched (bf16-operand) reference.
    ref_bf16 = qnet_reference_bf16(state, action, params)
    assert jnp.allclose(q_val, ref_bf16, atol=1e-3, rtol=1e-3)

    # Loose sanity check against the exact f32 torch-equivalent math.
    ref_f32 = qnet_reference_f32(state, action, params)
    assert jnp.allclose(q_val, ref_f32, atol=5e-2, rtol=5e-2)

    # Also exercise the tiled / multi-grid-step (v7x megacore) path.
    B2 = 512
    kb_s, kb_a = jax.random.split(jax.random.PRNGKey(1))
    state2 = jax.random.normal(kb_s, (B2, len_s), jnp.float32)
    action2 = jax.random.normal(kb_a, (B2, len_a), jnp.float32)
    q2 = jax.block_until_ready(fwd(state2, action2, prepared))
    ref2 = qnet_reference_bf16(state2, action2, params)
    assert q2.shape == (B2, len_a)
    assert jnp.allclose(q2, ref2, atol=1e-3, rtol=1e-3)

    print("KERNEL_OK")
</pallas_src>

<mosaic_0001>
module attributes {stable_mosaic.version = 11 : i64} {
  func.func @qnet_kernel(%arg0: i32, %arg1: memref<24x8xbf16, #tpu.memory_space<vmem>>, %arg2: memref<256x24xbf16, #tpu.memory_space<vmem>>, %arg3: memref<256x1xf32, #tpu.memory_space<vmem>>, %arg4: memref<32x256xbf16, #tpu.memory_space<vmem>>, %arg5: memref<32x1xf32, #tpu.memory_space<vmem>>, %arg6: memref<8x32xbf16, #tpu.memory_space<vmem>>, %arg7: memref<8x1xf32, #tpu.memory_space<vmem>>, %arg8: memref<8x8xf32, #tpu.memory_space<vmem>>) attributes {dimension_semantics = [#tpu.dimension_semantics<parallel>], iteration_bounds = array<i64: 1>, scalar_prefetch = 0 : i64, scratch_operands = 0 : i64, tpu.core_type = #tpu.core_type<tc>, window_params = [{transform_indices = @transform_0, window_bounds = array<i64: 24, 8>}, {pipeline_mode = #tpu.pipeline_mode<synchronous>, transform_indices = @transform_1, window_bounds = array<i64: 256, 24>}, {pipeline_mode = #tpu.pipeline_mode<synchronous>, transform_indices = @transform_2, window_bounds = array<i64: 256, 1>}, {pipeline_mode = #tpu.pipeline_mode<synchronous>, transform_indices = @transform_3, window_bounds = array<i64: 32, 256>}, {pipeline_mode = #tpu.pipeline_mode<synchronous>, transform_indices = @transform_4, window_bounds = array<i64: 32, 1>}, {pipeline_mode = #tpu.pipeline_mode<synchronous>, transform_indices = @transform_5, window_bounds = array<i64: 8, 32>}, {pipeline_mode = #tpu.pipeline_mode<synchronous>, transform_indices = @transform_6, window_bounds = array<i64: 8, 1>}, {transform_indices = @transform_7, window_bounds = array<i64: 8, 8>}]} {
    %c0 = arith.constant 0 : index
    %c0_0 = arith.constant 0 : index
    %0 = vector.load %arg2[%c0, %c0_0] : memref<256x24xbf16, #tpu.memory_space<vmem>>, vector<256x24xbf16>
    %c0_1 = arith.constant 0 : index
    %c0_2 = arith.constant 0 : index
    %1 = vector.load %arg1[%c0_1, %c0_2] : memref<24x8xbf16, #tpu.memory_space<vmem>>, vector<24x8xbf16>
    %cst = arith.constant dense<0.000000e+00> : vector<256x8xf32>
    %2 = tpu.matmul %0, %1, %cst {dimension_numbers = #tpu.dot_dimension_numbers<[1], [0], [0], [1], [0, 0, 1, 1], [], []>} : vector<256x24xbf16>, vector<24x8xbf16>, vector<256x8xf32> -> vector<256x8xf32>
    %c0_3 = arith.constant 0 : index
    %c0_4 = arith.constant 0 : index
    %3 = vector.load %arg3[%c0_3, %c0_4] : memref<256x1xf32, #tpu.memory_space<vmem>>, vector<256x1xf32>
    %4 = vector.broadcast %3 : vector<256x1xf32> to vector<256x8xf32>
    %5 = arith.addf %2, %4 : vector<256x8xf32>
    %cst_5 = arith.constant 0.000000e+00 : f32
    %6 = vector.broadcast %cst_5 : f32 to vector<256x8xf32>
    %7 = arith.maximumf %5, %6 : vector<256x8xf32>
    %c0_6 = arith.constant 0 : index
    %c0_7 = arith.constant 0 : index
    %8 = vector.load %arg4[%c0_6, %c0_7] : memref<32x256xbf16, #tpu.memory_space<vmem>>, vector<32x256xbf16>
    %9 = arith.truncf %7 : vector<256x8xf32> to vector<256x8xbf16>
    %cst_8 = arith.constant dense<0.000000e+00> : vector<32x8xf32>
    %10 = tpu.matmul %8, %9, %cst_8 {dimension_numbers = #tpu.dot_dimension_numbers<[1], [0], [0], [1], [0, 0, 1, 1], [], []>} : vector<32x256xbf16>, vector<256x8xbf16>, vector<32x8xf32> -> vector<32x8xf32>
    %c0_9 = arith.constant 0 : index
    %c0_10 = arith.constant 0 : index
    %11 = vector.load %arg5[%c0_9, %c0_10] : memref<32x1xf32, #tpu.memory_space<vmem>>, vector<32x1xf32>
    %12 = vector.broadcast %11 : vector<32x1xf32> to vector<32x8xf32>
    %13 = arith.addf %10, %12 : vector<32x8xf32>
    %cst_11 = arith.constant 0.000000e+00 : f32
    %14 = vector.broadcast %cst_11 : f32 to vector<32x8xf32>
    %15 = arith.maximumf %13, %14 : vector<32x8xf32>
    %c0_12 = arith.constant 0 : index
    %c0_13 = arith.constant 0 : index
    %16 = vector.load %arg6[%c0_12, %c0_13] : memref<8x32xbf16, #tpu.memory_space<vmem>>, vector<8x32xbf16>
    %17 = arith.truncf %15 : vector<32x8xf32> to vector<32x8xbf16>
    %cst_14 = arith.constant dense<0.000000e+00> : vector<8x8xf32>
    %18 = tpu.matmul %16, %17, %cst_14 {dimension_numbers = #tpu.dot_dimension_numbers<[1], [0], [0], [1], [0, 0, 1, 1], [], []>} : vector<8x32xbf16>, vector<32x8xbf16>, vector<8x8xf32> -> vector<8x8xf32>
    %c0_15 = arith.constant 0 : index
    %c0_16 = arith.constant 0 : index
    %19 = vector.load %arg7[%c0_15, %c0_16] : memref<8x1xf32, #tpu.memory_space<vmem>>, vector<8x1xf32>
    %20 = vector.broadcast %19 : vector<8x1xf32> to vector<8x8xf32>
    %21 = arith.addf %18, %20 : vector<8x8xf32>
    %c0_17 = arith.constant 0 : index
    %c0_18 = arith.constant 0 : index
    %22 = vector.load %arg8[%c0_17, %c0_18] : memref<8x8xf32, #tpu.memory_space<vmem>>, vector<8x8xf32>
    tpu.vector_store %arg8[%c0_17, %c0_18], %21 {strides = array<i32>} : memref<8x8xf32, #tpu.memory_space<vmem>>, vector<8x8xf32>,
    return
  }
  func.func @transform_0(%arg0: i32) -> (i32, i32) {
    %c0_i32 = arith.constant 0 : i32
    %c0_i32_0 = arith.constant 0 : i32
    return %c0_i32, %arg0 : i32, i32
  }
  func.func @transform_1(%arg0: i32) -> (i32, i32) {
    %c0_i32 = arith.constant 0 : i32
    %c0_i32_0 = arith.constant 0 : i32
    %c0_i32_1 = arith.constant 0 : i32
    return %c0_i32, %c0_i32_0 : i32, i32
  }
  func.func @transform_2(%arg0: i32) -> (i32, i32) {
    %c0_i32 = arith.constant 0 : i32
    %c0_i32_0 = arith.constant 0 : i32
    %c0_i32_1 = arith.constant 0 : i32
    return %c0_i32, %c0_i32_0 : i32, i32
  }
  func.func @transform_3(%arg0: i32) -> (i32, i32) {
    %c0_i32 = arith.constant 0 : i32
    %c0_i32_0 = arith.constant 0 : i32
    %c0_i32_1 = arith.constant 0 : i32
    return %c0_i32, %c0_i32_0 : i32, i32
  }
  func.func @transform_4(%arg0: i32) -> (i32, i32) {
    %c0_i32 = arith.constant 0 : i32
    %c0_i32_0 = arith.constant 0 : i32
    %c0_i32_1 = arith.constant 0 : i32
    return %c0_i32, %c0_i32_0 : i32, i32
  }
  func.func @transform_5(%arg0: i32) -> (i32, i32) {
    %c0_i32 = arith.constant 0 : i32
    %c0_i32_0 = arith.constant 0 : i32
    %c0_i32_1 = arith.constant 0 : i32
    return %c0_i32, %c0_i32_0 : i32, i32
  }
  func.func @transform_6(%arg0: i32) -> (i32, i32) {
    %c0_i32 = arith.constant 0 : i32
    %c0_i32_0 = arith.constant 0 : i32
    %c0_i32_1 = arith.constant 0 : i32
    return %c0_i32, %c0_i32_0 : i32, i32
  }
  func.func @transform_7(%arg0: i32) -> (i32, i32) {
    %c0_i32 = arith.constant 0 : i32
    %c0_i32_0 = arith.constant 0 : i32
    return %c0_i32, %arg0 : i32, i32
  }
}

</mosaic_0001>

<bundles_post_ra>
// kernel: qnet_forward.1
= control target key start
LH: loop header
LB: loop body
LE: loop exit
PB: predicated region body
PF: predicated region fallthrough
CT: control target
= control target key end

     0   :  { %v927_v0 = vmov 0   ;;  %vm343_vm0 = vcmask 195584   ;;  %vm392_vm1 = vcmask 1043456   ;;  %vm929_vm2 = vmmov 0   ;;  %s1241_s0 = inlined_call_operand.vmem [shape: bf16[24,8], index: 0, kind: input, shape index: {}]   ;;  %s1242_s1 = inlined_call_operand.vmem [shape: bf16[256,24], index: 1, kind: input, shape index: {}]   ;;  %s1243_s2 = inlined_call_operand.vmem [shape: f32[256,1], index: 2, kind: input, shape index: {}]   ;;  %s1244_s4 = inlined_call_operand.vmem [shape: f32[32,1], index: 4, kind: input, shape index: {}]   ;;  %s1245_s6 = inlined_call_operand.vmem [shape: f32[8,1], index: 6, kind: input, shape index: {}]   ;;  %s1246_s3 = inlined_call_operand.vmem [shape: bf16[32,256], index: 3, kind: input, shape index: {}]   ;;  %s1247_s5 = inlined_call_operand.vmem [shape: bf16[8,32], index: 5, kind: input, shape index: {}]   ;;  %s1248_s7 = inlined_call_operand.vmem [shape: f32[8,8], index: 7, kind: output, shape index: {}]  }
   0x1   :  { %901 = vset.pattern.permute.xlu0 %v927_v0  ;;  %902 = vset.pattern.permute.xlu1 %v927_v0  ;;  %v903_v1 = vld [vmem:[%s1241_s0] sm:$0xff]   ;;  %v904_v2 = vld [vmem:[%s1241_s0 + $0x8] ss:$0 sps:$4 sm:$0xff]   ;;  %v907_v7 = vld [vmem:[%s1242_s1 + $0x10] sm:$0xff]   ;;  %vm715_vm3 = vcmask 261120   ;;  %vm759_vm4 = vcmask 64512  }
   0x2   :  { %v905_v3 = vld [vmem:[%s1242_s1] sm:$0xff]   ;;  %853 = vmatprep.subr.bf16.mxu0 %v903_v1  ;;  %v394_v4 = vsel %vm392_vm1, %v904_v2, 0  ;;  %v906_v5 = vld [vmem:[%s1242_s1 + $0x8] sm:$0xff]   ;;  %v80_v11 = vld [vmem:[%s1243_s2 + $0x90] sm:$0xff] }
   0x3   :  { %854 = vmatpush3.bf16.msra.mxu0 %v903_v1  ;;  %857 = vmatprep.mubr.msk.bf16.mxu0 %vm343_vm0, %v905_v3  ;;  %v78_v6 = vld [vmem:[%s1243_s2 + $0x80] sm:$0xff]  ;;  %v79_v8 = vld [vmem:[%s1243_s2 + $0x88] sm:$0xff]  ;;  %v81_v12 = vld [vmem:[%s1243_s2 + $0x98] sm:$0xff] }
   0x4   :  { %897 = vmatprep.subr.msk.bf16.mxu0 %vm392_vm1, %v904_v2  ;;  %176 = vperm.xlu0 %901, %v78_v6   ;;  %v62_v9 = vld [vmem:[%s1243_s2] sm:$0xff]  ;;  %v63_v10 = vld [vmem:[%s1243_s2 + $0x8] sm:$0xff]  ;;  %v908_v13 = vld [vmem:[%s1242_s1 + $0x18] sm:$0xff]  }
   0x5   :  { %96 = vperm.xlu1 %902, %v62_v9   ;;  %v909_v14 = vld [vmem:[%s1242_s1 + $0x20] sm:$0xff]   ;;  %v64_v15 = vld [vmem:[%s1243_s2 + $0x10] sm:$0xff]  ;;  %v65_v16 = vld [vmem:[%s1243_s2 + $0x18] sm:$0xff] }
   0x6   :  { %v82_v17 = vld [vmem:[%s1243_s2 + $0xa0] sm:$0xff]  ;;  %v83_v18 = vld [vmem:[%s1243_s2 + $0xa8] sm:$0xff]  ;;  %v911_v20 = vld [vmem:[%s1242_s1 + $0x30] sm:$0xff]  }
   0x7   :  { %856 = vmatpush3.bf16.msra.mxu0 %v394_v4  ;;  %v910_v19 = vld [vmem:[%s1242_s1 + $0x28] sm:$0xff]   ;;  %v66_v21 = vld [vmem:[%s1243_s2 + $0x20] sm:$0xff]  ;;  %v84_v23 = vld [vmem:[%s1243_s2 + $0xb0] sm:$0xff] }
   0x8   :  { %181 = vperm.xlu0 %901, %v79_v8   ;;  %v67_v22 = vld [vmem:[%s1243_s2 + $0x28] sm:$0xff]  ;;  %v85_v24 = vld [vmem:[%s1243_s2 + $0xb8] sm:$0xff]  ;;  %v913_v26 = vld [vmem:[%s1242_s1 + $0x40] sm:$0xff]  }
   0x9   :  { %101 = vperm.xlu1 %902, %v63_v10   ;;  %v912_v25 = vld [vmem:[%s1242_s1 + $0x38] sm:$0xff]   ;;  %v68_v27 = vld [vmem:[%s1243_s2 + $0x30] sm:$0xff]  ;;  %v86_v29 = vld [vmem:[%s1243_s2 + $0xc0] sm:$0xff] }
   0xa   :  { %858 = vmatmul.mubr.msk.bf16.vlgmr.msra.gmra.mrb[0].mxu0 %vm343_vm0, %v906_v5  ;;  %v69_v28 = vld [vmem:[%s1243_s2 + $0x38] sm:$0xff]  ;;  %v87_v30 = vld [vmem:[%s1243_s2 + $0xc8] sm:$0xff]  ;;  %v915_v32 = vld [vmem:[%s1242_s1 + $0x50] sm:$0xff]  }
   0xb   :  { %861 = vmatprep.mubr.msk.bf16.mxu0 %vm343_vm0, %v907_v7  ;;  %v914_v31 = vld [vmem:[%s1242_s1 + $0x48] sm:$0xff]   ;;  %v70_v33 = vld [vmem:[%s1243_s2 + $0x40] sm:$0xff]  ;;  %v88_v35 = vld [vmem:[%s1243_s2 + $0xd0] sm:$0xff] }
   0xc   :  { %186 = vperm.xlu0 %901, %v80_v11   ;;  %v71_v34 = vld [vmem:[%s1243_s2 + $0x48] sm:$0xff]  ;;  %v89_v36 = vld [vmem:[%s1243_s2 + $0xd8] sm:$0xff]  ;;  %v917_v38 = vld [vmem:[%s1242_s1 + $0x60] sm:$0xff]  }
   0xd   :  { %191 = vperm.xlu1 %902, %v81_v12   ;;  %v916_v37 = vld [vmem:[%s1242_s1 + $0x58] sm:$0xff]   ;;  %v72_v39 = vld [vmem:[%s1243_s2 + $0x50] sm:$0xff]  ;;  %v90_v41 = vld [vmem:[%s1243_s2 + $0xe0] sm:$0xff] }
   0xe   :  { %v73_v40 = vld [vmem:[%s1243_s2 + $0x58] sm:$0xff]  ;;  %v91_v42 = vld [vmem:[%s1243_s2 + $0xe8] sm:$0xff]  ;;  %v919_v44 = vld [vmem:[%s1242_s1 + $0x70] sm:$0xff]  }
   0xf   :  { %v918_v43 = vld [vmem:[%s1242_s1 + $0x68] sm:$0xff]   ;;  %v74_v45 = vld [vmem:[%s1243_s2 + $0x60] sm:$0xff]  ;;  %v92_v47 = vld [vmem:[%s1243_s2 + $0xf0] sm:$0xff] }
  0x10   :  { %106 = vperm.xlu0 %901, %v64_v15   ;;  %v75_v46 = vld [vmem:[%s1243_s2 + $0x68] sm:$0xff]  ;;  %v93_v48 = vld [vmem:[%s1243_s2 + $0xf8] sm:$0xff]  ;;  %v76_v50 = vld [vmem:[%s1243_s2 + $0x70] sm:$0xff] }
  0x11   :  { %111 = vperm.xlu1 %902, %v65_v16   ;;  %v920_v49 = vld [vmem:[%s1242_s1 + $0x78] sm:$0xff]   ;;  %v609_v52 = vld [vmem:[%s1244_s4] sm:$0xff]  ;;  %v610_v53 = vld [vmem:[%s1244_s4 + $0x8] sm:$0xff] }
  0x12   :  { %862 = vmatmul.mubr.msk.bf16.gmra.mrb[4].mxu0 %vm343_vm0, %v908_v13  ;;  %v77_v51 = vld [vmem:[%s1243_s2 + $0x78] sm:$0xff]  ;;  %v611_v54 = vld [vmem:[%s1244_s4 + $0x10] sm:$0xff]  ;;  %v709_v56 = vld [vmem:[%s1245_s6] sm:$0xff] }
  0x13   :  { %865 = vmatprep.mubr.msk.bf16.mxu0 %vm343_vm0, %v909_v14  ;;  %v612_v55 = vld [vmem:[%s1244_s4 + $0x18] sm:$0xff]  ;;  %v923_v61 = vld [vmem:[%s1246_s3 + $0x4] ss:$8 sps:$4 sm:$0xff]  }
  0x14   :  { %196 = vperm.xlu0 %901, %v82_v17   ;;  %685 = vmatprep.mubr.bf16.mxu1 %v923_v61 }
  0x15   :  { %201 = vperm.xlu1 %902, %v83_v18  }
  0x18   :  { %116 = vperm.xlu0 %901, %v66_v21  }
  0x19   :  { %121 = vperm.xlu1 %902, %v67_v22  }
  0x1a   :  { %866 = vmatmul.mubr.msk.bf16.gmra.mrb[8].mxu0 %vm343_vm0, %v910_v19 }
  0x1b   :  { %869 = vmatprep.mubr.msk.bf16.mxu0 %vm343_vm0, %v911_v20 }
  0x1c   :  { %206 = vperm.xlu0 %901, %v84_v23  }
  0x1d   :  { %211 = vperm.xlu1 %902, %v85_v24  }
  0x20   :  { %126 = vperm.xlu0 %901, %v68_v27  }
  0x21   :  { %131 = vperm.xlu1 %902, %v69_v28  }
  0x22   :  { %870 = vmatmul.mubr.msk.bf16.gmra.mrb[12].mxu0 %vm343_vm0, %v912_v25 }
  0x23   :  { %873 = vmatprep.mubr.msk.bf16.mxu0 %vm343_vm0, %v913_v26 }
  0x24   :  { %216 = vperm.xlu0 %901, %v86_v29  }
  0x25   :  { %221 = vperm.xlu1 %902, %v87_v30  }
  0x28   :  { %136 = vperm.xlu0 %901, %v70_v33  }
  0x29   :  { %141 = vperm.xlu1 %902, %v71_v34  }
  0x2a   :  { %874 = vmatmul.mubr.msk.bf16.gmra.mrb[16].mxu0 %vm343_vm0, %v914_v31 }
  0x2b   :  { %877 = vmatprep.mubr.msk.bf16.mxu0 %vm343_vm0, %v915_v32 }
  0x2c   :  { %226 = vperm.xlu0 %901, %v88_v35  }
  0x2d   :  { %231 = vperm.xlu1 %902, %v89_v36  }
  0x30   :  { %146 = vperm.xlu0 %901, %v72_v39  }
  0x31   :  { %151 = vperm.xlu1 %902, %v73_v40  }
  0x32   :  { %878 = vmatmul.mubr.msk.bf16.gmra.mrb[20].mxu0 %vm343_vm0, %v916_v37 }
  0x33   :  { %881 = vmatprep.mubr.msk.bf16.mxu0 %vm343_vm0, %v917_v38 }
  0x34   :  { %236 = vperm.xlu0 %901, %v90_v41  }
  0x35   :  { %241 = vperm.xlu1 %902, %v91_v42  }
  0x38   :  { %156 = vperm.xlu0 %901, %v74_v45  }
  0x39   :  { %161 = vperm.xlu1 %902, %v75_v46  }
  0x3a   :  { %882 = vmatmul.mubr.msk.bf16.gmra.mrb[24].mxu0 %vm343_vm0, %v918_v43 }
  0x3b   :  { %885 = vmatprep.mubr.msk.bf16.mxu0 %vm343_vm0, %v919_v44 }
  0x3c   :  { %246 = vperm.xlu0 %901, %v92_v47  }
  0x3d   :  { %251 = vperm.xlu1 %902, %v93_v48  }
  0x40   :  { %166 = vperm.xlu0 %901, %v76_v50  }
  0x41   :  { %171 = vperm.xlu1 %902, %v77_v51  }
  0x42   :  { %886 = vmatmul.mubr.msk.bf16.gmra.mrb[28].mxu0 %vm343_vm0, %v920_v49 }
  0x44   :  { %615 = vperm.xlu0 %901, %v609_v52  }
  0x45   :  { %620 = vperm.xlu1 %902, %v610_v53  }
  0x48   :  { %625 = vperm.xlu0 %901, %v611_v54  }
  0x49   :  { %630 = vperm.xlu1 %902, %v612_v55  }
  0x4c   :  { %712 = vperm.xlu0 %901, %v709_v56  }
  0x83   :  { %v1151_v57 = vpop.permute.xlu0 %176 }
  0x84   :  { %v97_v58 = vpop.permute.xlu1 %96 }
  0x87   :  { %v1153_v59 = vpop.permute.xlu0 %181 }
  0x88   :  { %v102_v60 = vpop.permute.xlu1 %101 }
  0x8b   :  { %v1158_v62 = vpop.permute.xlu0 %186 }
  0x8c   :  { %v1160_v63 = vpop.permute.xlu1 %191 }
  0x8f   :  { %v107_v0 = vpop.permute.xlu0 %106 }
  0x90   :  { %v112_v1 = vpop.permute.xlu1 %111 }
  0x93   :  { %v1162_v2 = vpop.permute.xlu0 %196 }
  0x94   :  { %v1164_v3 = vpop.permute.xlu1 %201 }
  0x97   :  { %v117_v4 = vpop.permute.xlu0 %116 }
  0x98   :  { %v122_v5 = vpop.permute.xlu1 %121 }
  0x9b   :  { %v1166_v6 = vpop.permute.xlu0 %206 }
  0x9c   :  { %v1168_v7 = vpop.permute.xlu1 %211 }
  0x9f   :  { %v127_v8 = vpop.permute.xlu0 %126 }
  0xa0   :  { %v132_v9 = vpop.permute.xlu1 %131 }
  0xa3   :  { %v1170_v10 = vpop.permute.xlu0 %216 }
  0xa4   :  { %v1172_v11 = vpop.permute.xlu1 %221 }
  0xa7   :  { %v137_v12 = vpop.permute.xlu0 %136 }
  0xa8   :  { %v142_v13 = vpop.permute.xlu1 %141 }
  0xab   :  { %v1174_v14 = vpop.permute.xlu0 %226 }
  0xac   :  { %v1176_v15 = vpop.permute.xlu1 %231 }
  0xaf   :  { %v147_v16 = vpop.permute.xlu0 %146 }
  0xb0   :  { %v152_v20 = vpop.permute.xlu1 %151 }
  0xb3   :  { %v1178_v28 = vpop.permute.xlu0 %236 }
  0xb4   :  { %v1182_v32 = vpop.permute.xlu1 %241 }
  0xb7   :  { %v157_v41 = vpop.permute.xlu0 %156 }
  0xb8   :  { %v162_v45 = vpop.permute.xlu1 %161 }
  0xbb   :  { %v1190_v53 = vpop.permute.xlu0 %246 }
  0xdd   :  { %v859_v17 = vpop.f32.mrb[0].mxu0 }
  0xde   :  { %v439_v18 = vadd.f32 %v859_v17, %v107_v0  ;;  %v430_v19 = vpop.f32.mrb[1].mxu0 }
  0xdf   :  { %v431_v21 = vadd.f32 %v430_v19, %v97_v58  ;;  %v860_v22 = vpop.f32.mrb[2].mxu0 }
  0xe0   :  { %v442_v23 = vadd.f32 %v860_v22, %v112_v1  ;;  %v433_v24 = vpop.f32.mrb[3].mxu0  ;;  %v559_v26 = vmax.f32 %v439_v18, 0.0 }
  0xe1   :  { %v434_v25 = vadd.f32 %v433_v24, %v102_v60  ;;  %v557_v29 = vmax.f32 %v431_v21, 0.0  ;;  %v1192_v60 = vpop.permute.xlu1 %251 }
  0xe2   :  { %v560_v27 = vmax.f32 %v442_v23, 0.0 }
  0xe3   :  { %v558_v30 = vmax.f32 %v434_v25, 0.0 }
  0xe4   :  { %v1180_v31 = vpack.c.bf16 %v560_v27, %v559_v26 }
  0xe5   :  { %v863_v33 = vpop.f32.mrb[4].mxu0  ;;  %v1184_v34 = vpack.c.bf16 %v558_v30, %v557_v29  ;;  %v172_v21 = vpop.permute.xlu1 %171 }
  0xe6   :  { %v455_v35 = vadd.f32 %v863_v33, %v127_v8  ;;  %v446_v36 = vpop.f32.mrb[5].mxu0 }
  0xe7   :  { %v447_v37 = vadd.f32 %v446_v36, %v117_v4  ;;  %v864_v38 = vpop.f32.mrb[6].mxu0 }
  0xe8   :  { %v458_v39 = vadd.f32 %v864_v38, %v132_v9  ;;  %v449_v40 = vpop.f32.mrb[7].mxu0  ;;  %v563_v43 = vmax.f32 %v455_v35, 0.0  ;;  %v167_v9 = vpop.permute.xlu0 %166 }
  0xe9   :  { %v450_v42 = vadd.f32 %v449_v40, %v122_v5  ;;  %v561_v46 = vmax.f32 %v447_v37, 0.0 }
  0xea   :  { %v564_v44 = vmax.f32 %v458_v39, 0.0 }
  0xeb   :  { %v562_v47 = vmax.f32 %v450_v42, 0.0 }
  0xec   :  { %v1186_v48 = vpack.c.bf16 %v564_v44, %v563_v43 }
  0xed   :  { %v1188_v49 = vpack.c.bf16 %v562_v47, %v561_v46  ;;  %v867_v50 = vpop.f32.mrb[8].mxu0 }
  0xee   :  { %v471_v51 = vadd.f32 %v867_v50, %v147_v16  ;;  %v462_v52 = vpop.f32.mrb[9].mxu0 }
  0xef   :  { %v463_v54 = vadd.f32 %v462_v52, %v137_v12  ;;  %v868_v55 = vpop.f32.mrb[10].mxu0 }
  0xf0   :  { %v474_v56 = vadd.f32 %v868_v55, %v152_v20  ;;  %v465_v58 = vpop.f32.mrb[11].mxu0  ;;  %v567_v0 = vmax.f32 %v471_v51, 0.0 }
  0xf1   :  { %v466_v61 = vadd.f32 %v465_v58, %v142_v13  ;;  %v565_v4 = vmax.f32 %v463_v54, 0.0 }
  0xf2   :  { %v568_v1 = vmax.f32 %v474_v56, 0.0 }
  0xf3   :  { %v566_v5 = vmax.f32 %v466_v61, 0.0 }
  0xf4   :  { %v1194_v8 = vpack.c.bf16 %v568_v1, %v567_v0 }
  0xf5   :  { %v1196_v17 = vpack.c.bf16 %v566_v5, %v565_v4  ;;  %v871_v16 = vpop.f32.mrb[12].mxu0 }
  0xf6   :  { %v487_v18 = vadd.f32 %v871_v16, %v167_v9  ;;  %v478_v19 = vpop.f32.mrb[13].mxu0 }
  0xf7   :  { %v479_v12 = vadd.f32 %v478_v19, %v157_v41  ;;  %v872_v22 = vpop.f32.mrb[14].mxu0 }
  0xf8   :  { %v490_v20 = vadd.f32 %v872_v22, %v172_v21  ;;  %v481_v23 = vpop.f32.mrb[15].mxu0  ;;  %v571_v25 = vmax.f32 %v487_v18, 0.0 }
  0xf9   :  { %v482_v24 = vadd.f32 %v481_v23, %v162_v45  ;;  %v569_v26 = vmax.f32 %v479_v12, 0.0 }
  0xfa   :  { %v572_v13 = vmax.f32 %v490_v20, 0.0 }
  0xfb   :  { %v570_v27 = vmax.f32 %v482_v24, 0.0 }
  0xfc   :  { %v1198_v29 = vpack.c.bf16 %v572_v13, %v571_v25 }
  0xfd   :  { %v1200_v30 = vpack.c.bf16 %v570_v27, %v569_v26  ;;  %v875_v33 = vpop.f32.mrb[16].mxu0 }
  0xfe   :  { %v503_v35 = vadd.f32 %v875_v33, %v1158_v62  ;;  %v494_v36 = vpop.f32.mrb[17].mxu0 }
  0xff   :  { %v495_v37 = vadd.f32 %v494_v36, %v1151_v57  ;;  %v876_v38 = vpop.f32.mrb[18].mxu0 }
 0x100   :  { %v506_v39 = vadd.f32 %v876_v38, %v1160_v63  ;;  %v497_v40 = vpop.f32.mrb[19].mxu0  ;;  %v575_v42 = vmax.f32 %v503_v35, 0.0  ;;  %v621_v38 = vpop.permute.xlu1 %620 }
 0x101   :  { %v498_v41 = vadd.f32 %v497_v40, %v1153_v59  ;;  %v573_v44 = vmax.f32 %v495_v37, 0.0 }
 0x102   :  { %v576_v43 = vmax.f32 %v506_v39, 0.0 }
 0x103   :  { %v574_v45 = vmax.f32 %v498_v41, 0.0 }
 0x104   :  { %v602_v46 = vpack.c.bf16 %v576_v43, %v575_v42 }
 0x105   :  { %v879_v47 = vpop.f32.mrb[20].mxu0  ;;  %v601_v50 = vpack.c.bf16 %v574_v45, %v573_v44 }
 0x106   :  { %v519_v51 = vadd.f32 %v879_v47, %v1166_v6  ;;  %v510_v52 = vpop.f32.mrb[21].mxu0 }
 0x107   :  { %v511_v62 = vadd.f32 %v510_v52, %v1162_v2  ;;  %v880_v54 = vpop.f32.mrb[22].mxu0  ;;  %822 = vmatprep.subr.bf16.mxu1 %v601_v50 }
 0x108   :  { %v522_v57 = vadd.f32 %v880_v54, %v1168_v7  ;;  %v513_v63 = vpop.f32.mrb[23].mxu0  ;;  %823 = vmatpush3.bf16.msra.mxu1 %v1184_v34  ;;  %v579_v55 = vmax.f32 %v519_v51, 0.0 }
 0x109   :  { %v514_v59 = vadd.f32 %v513_v63, %v1164_v3  ;;  %824 = vmatprep.subr.bf16.mxu1 %v602_v46  ;;  %v577_v58 = vmax.f32 %v511_v62, 0.0  ;;  %v631_v62 = vpop.permute.xlu1 %630 }
 0x10a   :  { %v580_v56 = vmax.f32 %v522_v57, 0.0 }
 0x10b   :  { %v578_v61 = vmax.f32 %v514_v59, 0.0 }
 0x10c   :  { %v604_v0 = vpack.c.bf16 %v580_v56, %v579_v55  ;;  %825 = vmatpush3.bf16.msra.mxu1 %v1180_v31  ;;  %v706_v55 = vld [vmem:[%s1247_s5] sm:$0xf] }
 0x10d   :  { %v603_v6 = vpack.c.bf16 %v578_v61, %v577_v58  ;;  %v883_v1 = vpop.f32.mrb[24].mxu0 }
 0x10e   :  { %v535_v2 = vadd.f32 %v883_v1, %v1174_v14  ;;  %v526_v4 = vpop.f32.mrb[25].mxu0 }
 0x10f   :  { %v527_v7 = vadd.f32 %v526_v4, %v1170_v10  ;;  %v884_v5 = vpop.f32.mrb[26].mxu0  ;;  %826 = vmatprep.subr.bf16.mxu1 %v603_v6 }
 0x110   :  { %v538_v34 = vadd.f32 %v884_v5, %v1176_v15  ;;  %v529_v3 = vpop.f32.mrb[27].mxu0  ;;  %827 = vmatpush3.bf16.msra.mxu1 %v1188_v49  ;;  %v583_v16 = vmax.f32 %v535_v2, 0.0 }
 0x111   :  { %v530_v9 = vadd.f32 %v529_v3, %v1172_v11  ;;  %828 = vmatprep.subr.bf16.mxu1 %v604_v0  ;;  %v581_v31 = vmax.f32 %v527_v7, 0.0 }
 0x112   :  { %v584_v18 = vmax.f32 %v538_v34, 0.0 }
 0x113   :  { %v582_v19 = vmax.f32 %v530_v9, 0.0 }
 0x114   :  { %v606_v21 = vpack.c.bf16 %v584_v18, %v583_v16  ;;  %829 = vmatpush3.bf16.msra.mxu1 %v1186_v48 }
 0x115   :  { %v605_v14 = vpack.c.bf16 %v582_v19, %v581_v31  ;;  %v887_v12 = vpop.f32.mrb[28].mxu0 }
 0x116   :  { %v551_v10 = vadd.f32 %v887_v12, %v1190_v53  ;;  %v542_v22 = vpop.f32.mrb[29].mxu0 }
 0x117   :  { %v543_v15 = vadd.f32 %v542_v22, %v1178_v28  ;;  %v888_v20 = vpop.f32.mrb[30].mxu0  ;;  %830 = vmatprep.subr.bf16.mxu1 %v605_v14  ;;  %v921_v28 = vld [vmem:[%s1246_s3] ss:$8 sps:$4 sm:$0xff]  }
 0x118   :  { %v554_v49 = vadd.f32 %v888_v20, %v1192_v60  ;;  %v545_v11 = vpop.f32.mrb[31].mxu0  ;;  %831 = vmatpush3.bf16.msra.mxu1 %v1196_v17  ;;  %v587_v24 = vmax.f32 %v551_v10, 0.0  ;;  %v926_v60 = vld [vmem:[%s1246_s3 + $0x10] ss:$8 sps:$4 sm:$0xff]  }
 0x119   :  { %v546_v23 = vadd.f32 %v545_v11, %v1182_v32  ;;  %832 = vmatprep.subr.bf16.mxu1 %v606_v21  ;;  %v585_v48 = vmax.f32 %v543_v15, 0.0  ;;  %v924_v32 = vld [vmem:[%s1246_s3 + $0x14] ss:$8 sps:$4 sm:$0xff]  }
 0x11a   :  { %v588_v25 = vmax.f32 %v554_v49, 0.0 }
 0x11b   :  { %v586_v13 = vmax.f32 %v546_v23, 0.0 }
 0x11c   :  { %v608_v26 = vpack.c.bf16 %v588_v25, %v587_v24  ;;  %833 = vmatpush3.bf16.msra.mxu1 %v1194_v8  ;;  %v928_v8 = vmov 0.0  }
 0x11d   :  { %v607_v53 = vpack.c.bf16 %v586_v13, %v585_v48 }
 0x11f   :  { %834 = vmatprep.subr.bf16.mxu1 %v607_v53 }
 0x120   :  { %835 = vmatpush3.bf16.msra.mxu1 %v1200_v30 }
 0x121   :  { %836 = vmatprep.subr.bf16.mxu1 %v608_v26 }
 0x124   :  { %837 = vmatpush3.bf16.msra.mxu1 %v1198_v29  ;;  %v616_v29 = vpop.permute.xlu0 %615 }
 0x125   :  { %889 = vmatprep.subr.bf16.mxu1 %v928_v8 }
 0x127   :  { %686 = vmatmul.mubr.bf16.vlgmr.msra.gmra.mrb[0].mxu1 %v921_v28 }
 0x128   :  { %693 = vmatprep.mubr.bf16.mxu1 %v924_v32  ;;  %v626_v47 = vpop.permute.xlu0 %625 }
 0x12c   :  { %v713_v56 = vpop.permute.xlu0 %712 }
 0x12f   :  { %694 = vmatmul.mubr.bf16.gmra.mrb[4].mxu1 %v926_v60 }
 0x130   :  { %893 = vmatprep.mubr.msk.bf16.mxu1 %vm929_vm2, %v928_v8 }
 0x1fa   :  { %v838_v17 = vpop.f32.mrb[0].mxu1 }
 0x1fb   :  { %v839_v27 = vpop.f32.mrb[1].mxu1 }
 0x1fc   :  { %v840_v30 = vadd.f32 %v839_v27, %v838_v17  ;;  %v841_v33 = vpop.f32.mrb[2].mxu1 }
 0x1fd   :  { %v842_v35 = vpop.f32.mrb[3].mxu1 }
 0x1fe   :  { %v688_v36 = vadd.f32 %v840_v30, %v616_v29  ;;  %v843_v37 = vadd.f32 %v842_v35, %v841_v33 }
 0x200   :  { %v691_v39 = vadd.f32 %v843_v37, %v621_v38  ;;  %v702_v40 = vmax.f32 %v688_v36, 0.0 }
 0x202   :  { %v703_v41 = vmax.f32 %v691_v39, 0.0  ;;  %v844_v42 = vpop.f32.mrb[4].mxu1 }
 0x203   :  { %v845_v43 = vpop.f32.mrb[5].mxu1 }
 0x204   :  { %v707_v44 = vpack.c.bf16 %v703_v41, %v702_v40  ;;  %v846_v45 = vadd.f32 %v845_v43, %v844_v42  ;;  %v847_v46 = vpop.f32.mrb[6].mxu1 }
 0x205   :  { %v848_v50 = vpop.f32.mrb[7].mxu1 }
 0x206   :  { %v696_v51 = vadd.f32 %v846_v45, %v626_v47  ;;  %v849_v52 = vadd.f32 %v848_v50, %v847_v46  ;;  %890 = vmatpush3.bf16.msra.mxu1 %v707_v44 }
 0x207   :  { %891 = vmatprep.subr.bf16.mxu1 %v928_v8 }
 0x208   :  { %v699_v54 = vadd.f32 %v849_v52, %v631_v62  ;;  %v704_v57 = vmax.f32 %v696_v51, 0.0 }
 0x20a   :  { %v705_v63 = vmax.f32 %v699_v54, 0.0 }
 0x20c   :  { %v708_v59 = vpack.c.bf16 %v705_v63, %v704_v57 }
 0x20e   :  { %892 = vmatpush3.bf16.msra.mxu1 %v708_v59 }
 0x211   :  { %894 = vmatmul.mubr.msk.bf16.vlgmr.msra.gmra.mrb[8].mxu1 %vm715_vm3, %v706_v55 }
 0x2e4   :  { %v753_v58 = vpop.f32.mrb[8].mxu1 }
 0x2e5   :  { %v754_v61 = vadd.f32 %v753_v58, %v713_v56  ;;  %v895_v0 = vpop.f32.mrb[9].mxu1 }
 0x2e6   :  { %v756_v6 = vpop.f32.mrb[10].mxu1 }
 0x2e7   :  { %760 = vst.msk [vmem:[%s1248_s7] sm:$0xff] %vm759_vm4, %v754_v61  ;;  %v896_v1 = vpop.f32.mrb[11].mxu1 }

</bundles_post_ra>
